<compile_context>
chip_gen: v7x
topology: tpu7x:2x2x1
jax: 0.10.0
libtpu: 0.0.40
codegen_flags: <defaults>
</compile_context>

<pallas_src>
import functools

import jax
import jax.numpy as jnp
from jax.experimental import pallas as pl
from jax.experimental.pallas import tpu as pltpu

_LANES = 128
_SUBLANES = 8
# 2048 rows * 128 lanes * 4 B = 1 MiB per f32 block.  With in+out blocks
# double-buffered that is ~4 MiB of VMEM — well inside the scoped-VMEM
# defaults on v5e (16 MiB), v6e (32 MiB) and v7x (32 MiB of 64 MiB physical),
# and already past the measured HBM-roofline knee (~85% of roofline at 512+
# row tiles on v6e).  2048 is a multiple of 8/16/32, so bf16 / fp8 sublane
# packing stays aligned too.
_MAX_TILE_ROWS = 2048


def _apply_activation(x, activation, beta=None):
    """VPU/EUP elementwise activation matching torch defaults."""
    if activation == "LeakyReLU":
        # torch.nn.LeakyReLU default negative_slope = 0.01
        return jnp.where(x >= 0, x, 0.01 * x)
    if activation == "ELU":
        # torch.nn.ELU default alpha = 1.0
        return jnp.where(x > 0, x, jnp.expm1(x))
    if activation == "ReLU":
        return jnp.maximum(x, jnp.zeros_like(x))
    if activation == "Tanh":
        return jnp.tanh(x)
    if activation == "Sigmoid":
        return jax.nn.sigmoid(x)
    if activation == "Swish":
        return jax.nn.sigmoid(beta * x) * x
    # WARNING: REQUIRED ACTIVATION IS NOT DEFINED -> identity passthrough
    return x


def _activ_kernel(x_ref, o_ref, *, activation):
    """Parameter-free activations: one (tile_rows, 128) VMEM tile."""
    x = x_ref[...]
    o_ref[...] = _apply_activation(x, activation).astype(o_ref.dtype)


def _swish_kernel(beta_ref, x_ref, o_ref):
    """Swish: sigmoid(beta * x) * x with beta held as an SMEM scalar."""
    beta = beta_ref[0, 0]
    x = x_ref[...]
    o_ref[...] = (jax.nn.sigmoid(beta * x) * x).astype(o_ref.dtype)


def _choose_tile_rows(rows):
    """Pick a block height: big (~1 MiB) blocks, (8,128)-aligned."""
    if rows > _MAX_TILE_ROWS:
        return _MAX_TILE_ROWS
    # Small / medium tensors: if we can split into two aligned blocks, do so,
    # so a v7x megacore (2 TCs, "parallel" grid axis) gets one block per core.
    if rows >= 4 * _SUBLANES and rows % (2 * _SUBLANES) == 0:
        return rows // 2
    # Otherwise a single block equal to the full array dims (always legal).
    return rows


def activ_forward(x, beta=None, activation="Swish"):
    """Forward pass of the `activ` module via a Pallas TPU kernel.

    x: any-shape float array (NCHW for conv features).
    beta: scalar parameter, required when activation == 'Swish'.
    """
    if activation == "Swish" and beta is None:
        raise ValueError("activation='Swish' requires a beta parameter")

    orig_shape = x.shape
    orig_dtype = x.dtype

    flat = x.reshape(-1)
    n = flat.shape[0]

    # Pad only the ragged tail up to a 128-lane multiple (usually a no-op for
    # conv feature maps where H*W is already a multiple of 128); the row axis
    # raggedness is handled in-kernel by Pallas partial-block masking.
    rem = n % _LANES
    if rem:
        flat = jnp.pad(flat, (0, _LANES - rem))
    rows = flat.shape[0] // _LANES
    x2d = flat.reshape(rows, _LANES)

    tile_rows = _choose_tile_rows(rows)
    grid = (pl.cdiv(rows, tile_rows),)

    x_spec = pl.BlockSpec((tile_rows, _LANES), lambda i: (i, 0))
    o_spec = pl.BlockSpec((tile_rows, _LANES), lambda i: (i, 0))
    out_shape = jax.ShapeDtypeStruct((rows, _LANES), x2d.dtype)
    cparams = pltpu.CompilerParams(dimension_semantics=("parallel",))

    if activation == "Swish":
        beta_arr = jnp.asarray(beta, dtype=jnp.float32).reshape(1, 1)
        out2d = pl.pallas_call(
            _swish_kernel,
            out_shape=out_shape,
            grid_spec=pltpu.PrefetchScalarGridSpec(
                num_scalar_prefetch=0,
                grid=grid,
                in_specs=[
                    pl.BlockSpec(memory_space=pltpu.MemorySpace.SMEM),  # beta
                    x_spec,
                ],
                out_specs=o_spec,
            ),
            compiler_params=cparams,
        )(beta_arr, x2d)
    else:
        kernel = functools.partial(_activ_kernel, activation=activation)
        out2d = pl.pallas_call(
            kernel,
            out_shape=out_shape,
            grid_spec=pltpu.PrefetchScalarGridSpec(
                num_scalar_prefetch=0,
                grid=grid,
                in_specs=[x_spec],
                out_specs=o_spec,
            ),
            compiler_params=cparams,
        )(x2d)

    out_flat = out2d.reshape(-1)
    if rem:
        out_flat = out_flat[:n]
    return out_flat.reshape(orig_shape).astype(orig_dtype)


def _reference(x, beta, activation):
    return _apply_activation(x, activation, beta)


if __name__ == "__main__":
    key = jax.random.PRNGKey(0)
    # NCHW input like a conv feature map: batch=2, channels=4, spatial=16x16
    x = jax.random.normal(key, (2, 4, 16, 16), dtype=jnp.float32)

    # Deterministic parameter init: Swish beta = 0.5 (nn.Parameter(torch.tensor(0.5)))
    beta = jnp.float32(0.5)

    ok = True
    for act_name in ["Swish", "ReLU", "LeakyReLU", "ELU", "Tanh", "Sigmoid"]:
        b = beta if act_name == "Swish" else None
        y = activ_forward(x, beta=b, activation=act_name)
        jax.block_until_ready(y)
        y_ref = _reference(x, beta, act_name)
        if not jnp.allclose(y, y_ref, atol=1e-5, rtol=1e-5):
            ok = False
            print(f"MISMATCH in activation {act_name}")

    # Additional check exercising the large-tile + ragged (partial last block)
    # path: 2*8*160*160 = 409600 elems -> 3200 rows -> grid of 2 with a
    # partial trailing block of 1152 rows.
    key2 = jax.random.PRNGKey(1)
    x_big = jax.random.normal(key2, (2, 8, 160, 160), dtype=jnp.float32)
    for act_name in ["Swish", "ReLU"]:
        b = beta if act_name == "Swish" else None
        y = activ_forward(x_big, beta=b, activation=act_name)
        jax.block_until_ready(y)
        y_ref = _reference(x_big, beta, act_name)
        if not jnp.allclose(y, y_ref, atol=1e-5, rtol=1e-5):
            ok = False
            print(f"MISMATCH (ragged path) in activation {act_name}")

    if ok:
        print("KERNEL_OK")
</pallas_src>

<mosaic_0001>
module attributes {stable_mosaic.version = 11 : i64} {
  func.func @_swish_kernel(%arg0: i32, %arg1: memref<1x1xf32, #tpu.memory_space<smem>>, %arg2: memref<16x128xf32, #tpu.memory_space<vmem>>, %arg3: memref<16x128xf32, #tpu.memory_space<vmem>>) attributes {dimension_semantics = [#tpu.dimension_semantics<parallel>], iteration_bounds = array<i64: 1>, scalar_prefetch = 0 : i64, scratch_operands = 0 : i64, tpu.core_type = #tpu.core_type<tc>, window_params = [{transform_indices = @transform_0, window_bounds = array<i64: 1, 1>}, {transform_indices = @transform_1, window_bounds = array<i64: 16, 128>}, {transform_indices = @transform_2, window_bounds = array<i64: 16, 128>}]} {
    %c0 = arith.constant 0 : index
    %c0_0 = arith.constant 0 : index
    %0 = memref.load %arg1[%c0, %c0_0] : memref<1x1xf32, #tpu.memory_space<smem>>
    %c0_1 = arith.constant 0 : index
    %c0_2 = arith.constant 0 : index
    %1 = vector.load %arg2[%c0_1, %c0_2] : memref<16x128xf32, #tpu.memory_space<vmem>>, vector<16x128xf32>
    %2 = vector.broadcast %0 : f32 to vector<16x128xf32>
    %3 = arith.mulf %2, %1 : vector<16x128xf32>
    %4 = arith.negf %3 : vector<16x128xf32>
    %5 = math.exp %4 : vector<16x128xf32>
    %cst = arith.constant 1.000000e+00 : f32
    %6 = vector.broadcast %cst : f32 to vector<16x128xf32>
    %7 = arith.addf %6, %5 : vector<16x128xf32>
    %8 = arith.divf %6, %7 : vector<16x128xf32>
    %9 = arith.mulf %8, %1 : vector<16x128xf32>
    %c0_3 = arith.constant 0 : index
    %c0_4 = arith.constant 0 : index
    %10 = vector.load %arg3[%c0_3, %c0_4] : memref<16x128xf32, #tpu.memory_space<vmem>>, vector<16x128xf32>
    tpu.vector_store %arg3[%c0_3, %c0_4], %9 {strides = array<i32>} : memref<16x128xf32, #tpu.memory_space<vmem>>, vector<16x128xf32>,
    return
  }
  func.func @transform_0(%arg0: i32) -> (i32, i32) {
    %c0_i32 = arith.constant 0 : i32
    %c0_i32_0 = arith.constant 0 : i32
    %c0_i32_1 = arith.constant 0 : i32
    return %c0_i32, %c0_i32_0 : i32, i32
  }
  func.func @transform_1(%arg0: i32) -> (i32, i32) {
    %c0_i32 = arith.constant 0 : i32
    %c0_i32_0 = arith.constant 0 : i32
    return %arg0, %c0_i32 : i32, i32
  }
  func.func @transform_2(%arg0: i32) -> (i32, i32) {
    %c0_i32 = arith.constant 0 : i32
    %c0_i32_0 = arith.constant 0 : i32
    return %arg0, %c0_i32 : i32, i32
  }
}

</mosaic_0001>

<bundles_post_ra>
// kernel: tpu_custom_call.1
= control target key start
LH: loop header
LB: loop body
LE: loop exit
PB: predicated region body
PF: predicated region fallthrough
CT: control target
= control target key end

     0   :  { %8 = vsyncpa [#allocation4], 0  ;;  %s180_s0 = inlined_call_operand.<no memory space> [shape: f32[1,1], index: 0, kind: input, shape index: {}]   ;;  %s181_s1 = inlined_call_operand.hbm [shape: f32[16,128], index: 1, kind: input, shape index: {}]   ;;  %s182_s2 = inlined_call_operand.hbm [shape: f32[16,128], index: 2, kind: output, shape index: {}]  }
   0x1   :  { %9 = vsyncpa [#allocation5], 0  ;;  %s128_s9 = smov [#allocation3]   ;;  %s80_s13 = scalar_lea.hbm %s181_s1, 256 }
   0x2   :  { %s17_s10 = sshll.u32 %s128_s9, 4  ;;  %p81_p0 = scmp.ne.s32.totalorder %s181_s1, %s80_s13  ;;  %s18_s10 = int_to_ptr.vmem [resolvable:$true] %s17_s10 }
   0x3   :  { %p84_p1 = scmp.lt.u32.totalorder %s80_s13, %s181_s1 }
   0x5   :  { %p86_p2 = pnand %p84_p1, %p81_p0 }
   0x7   :  { %89 = shalt.err (!%p86_p2)
}
   0x8   :  { %s90_s18 = scalar_lea.vmem %s18_s10, 256  ;;  %p95_p4 = scmp.lt.s32.totalorder %s18_s10, %s18_s10 }
   0x9   :  { %p91_p3 = scmp.ne.s32.totalorder %s18_s10, %s90_s18  ;;  %p96_p5 = scmp.lt.s32.totalorder %s90_s18, %s90_s18 }
   0xb   :  { %p97_p6 = por %p96_p5, %p95_p4 }
   0xd   :  { %p98_p7 = pnand %p97_p6, %p91_p3 }
   0xf   :  { %101 = shalt.err (!%p98_p7)
}
  0x10   :  { %s129_s19 = smov 128   ;;  %s130_s20 = smov 8  }
  0x11   :  { %23 = dma.hbm_to_vmem [thread:$0]  %s181_s1, 256, %s18_s10, [#allocation4], %s129_s19, %s129_s19, %s130_s20  }
  0x12   :  { %124 = dma.done.wait [#allocation4], 256  }
  0x13   :  { %125 = vsyncadd [#allocation4], 4294967040  ;;  %v30_v0 = vstv %s180_s0  ;;  %v28_v1 = vld [vmem:[#allocation3] sm:$0xff]  ;;  %v29_v2 = vld [vmem:[#allocation3 + $0x8] sm:$0xff]  ;;  %s131_s1 = smov [#allocation6]  }
  0x14   :  { %v31_v3 = vmul.f32 %v30_v0, %v28_v1  ;;  %v32_v4 = vmul.f32 %v30_v0, %v29_v2  ;;  %s54_s25 = sshll.u32 %s131_s1, 4  ;;  %s55_s25 = int_to_ptr.vmem [resolvable:$true] %s54_s25 }
  0x15   :  { %s102_s0 = scalar_lea.vmem %s55_s25, 256  ;;  %p107_p9 = scmp.lt.s32.totalorder %s55_s25, %s55_s25 }
  0x16   :  { %v66_v5 = vmul.f32 -1.442695, %v31_v3  ;;  %v67_v6 = vmul.f32 -1.442695, %v32_v4  ;;  %p103_p8 = scmp.ne.s32.totalorder %s55_s25, %s102_s0  ;;  %p108_p10 = scmp.lt.s32.totalorder %s102_s0, %s102_s0 }
  0x18   :  { %72 = vpow2.f32 %v66_v5  ;;  %p109_p11 = por %p108_p10, %p107_p9 }
  0x19   :  { %74 = vpow2.f32 %v67_v6 }
  0x1a   :  { %p110_p12 = pnand %p109_p11, %p103_p8 }
  0x22   :  { %v73_v7 = vpop.eup %72 }
  0x23   :  { %v75_v8 = vpop.eup %74  ;;  %v39_v9 = vadd.f32 1.0, %v73_v7 }
  0x24   :  { %v40_v10 = vadd.f32 1.0, %v75_v8 }
  0x25   :  { %76 = vrcp.f32 %v39_v9 }
  0x26   :  { %78 = vrcp.f32 %v40_v10 }
  0x2f   :  { %v77_v11 = vpop.eup %76 }
  0x30   :  { %v79_v12 = vpop.eup %78  ;;  %v45_v13 = vmul.f32 %v77_v11, %v28_v1 }
  0x31   :  { %v46_v14 = vmul.f32 %v79_v12, %v29_v2 }
  0x32   :  { %47 = vst [vmem:[#allocation6] sm:$0xff] %v45_v13 }
  0x33   :  { %48 = vst [vmem:[#allocation6 + $0x8] sm:$0xff] %v46_v14 }
  0x34   :  { %113 = shalt.err (!%p110_p12)
}
  0x35   :  { %s114_s28 = scalar_lea.hbm %s182_s2, 256 }
  0x36   :  { %p115_p13 = scmp.ne.s32.totalorder %s182_s2, %s114_s28  ;;  %p118_p0 = scmp.lt.u32.totalorder %s114_s28, %s182_s2 }
  0x38   :  { %p120_p1 = pnand %p118_p0, %p115_p13 }
  0x3a   :  { %123 = shalt.err (!%p120_p1)
}
  0x3b   :  { %60 = dma.vmem_to_hbm [thread:$0]  %s55_s25, 256, %s182_s2, [#allocation5], %s129_s19, %s129_s19, %s130_s20  }
  0x3c   :  { %126 = dma.done.wait [#allocation5], 256  }
  0x3d   :  { %127 = vsyncadd [#allocation5], 4294967040 }
  0x3e   :  { %64 = vsyncpa [#allocation4], 1 }
  0x3f   :  { %65 = vsyncpa [#allocation5], 1 }

</bundles_post_ra>
